<compile_context>
chip_gen: v6e
topology: v6e:2x2x1
jax: 0.10.0
libtpu: 0.0.40
codegen_flags: <defaults>
</compile_context>

<pallas_src>
import functools

import jax
import jax.numpy as jnp
from jax.experimental import pallas as pl
from jax.experimental.pallas import tpu as pltpu


def _round_up(x, m):
    return ((x + m - 1) // m) * m


def _mlp_kernel(widths, x_ref, w1_ref, w2_ref, w3_ref, w4_ref, b_ref, out_ref):
    """Fused 4-layer MLP on one (TILE_B, input) tile -> (TILE_B, out_pad) tile.

    widths = (h0, h1, h2, out_pad): static per-layer output widths.
    b_ref is a packed (4, bias_pad) f32 array; row l holds layer-l's bias.
    """
    h0, h1, h2, out_pad = widths
    acc = jnp.float32

    x = x_ref[...]  # bf16 (TILE_B, input_size)

    # Layer 1: Linear -> ReLU (-> Dropout = identity in eval mode)
    h = jnp.dot(x, w1_ref[...], preferred_element_type=acc) + b_ref[0:1, 0:h0]
    h = jnp.maximum(h, 0.0)

    # Layer 2: Linear -> ReLU (-> Dropout = identity)
    h = jnp.dot(h.astype(w2_ref.dtype), w2_ref[...],
                preferred_element_type=acc) + b_ref[1:2, 0:h1]
    h = jnp.maximum(h, 0.0)

    # Layer 3: Linear -> ReLU (-> Dropout = identity)
    h = jnp.dot(h.astype(w3_ref.dtype), w3_ref[...],
                preferred_element_type=acc) + b_ref[2:3, 0:h2]
    h = jnp.maximum(h, 0.0)

    # Layer 4: Linear -> Sigmoid, written lane-dense (out_pad = multiple of 128)
    h = jnp.dot(h.astype(w4_ref.dtype), w4_ref[...],
                preferred_element_type=acc) + b_ref[3:4, 0:out_pad]
    # sigmoid = 1 / (1 + exp(-h)); exp and approx reciprocal both issue on EUP.
    out_ref[...] = pl.reciprocal(1.0 + jnp.exp(-h), approx=True).astype(out_ref.dtype)


def detector_forward(x, params, *, max_tile_b=512, compute_dtype=jnp.bfloat16):
    """x: (batch, input_size) f32.  params: list of 4 (W[in,out], b[out]) pairs."""
    batch, input_size = x.shape
    h0 = params[0][0].shape[1]
    h1 = params[1][0].shape[1]
    h2 = params[2][0].shape[1]
    out_size = params[3][0].shape[1]
    out_pad = _round_up(out_size, 128)

    # Batch tiling: big, 8-aligned tiles; weights resident across grid steps.
    tile_b = min(max_tile_b, _round_up(batch, 8))
    padded_batch = _round_up(batch, tile_b)
    grid = (padded_batch // tile_b,)

    # bf16 operands for the MXU; accumulation stays f32 inside the kernel.
    xp = x.astype(compute_dtype)
    if padded_batch != batch:
        xp = jnp.pad(xp, ((0, padded_batch - batch), (0, 0)))

    w1 = params[0][0].astype(compute_dtype)
    w2 = params[1][0].astype(compute_dtype)
    w3 = params[2][0].astype(compute_dtype)
    # Pad the final weight to a lane-dense 128-multiple output width.
    w4 = jnp.pad(params[3][0], ((0, 0), (0, out_pad - out_size))).astype(compute_dtype)

    # Pack all four bias vectors into a single small f32 array -> one DMA.
    bias_w = _round_up(max(h0, h1, h2, out_pad), 128)
    b_packed = jnp.zeros((4, bias_w), jnp.float32)
    for i, (_, b) in enumerate(params):
        b_packed = b_packed.at[i, : b.shape[0]].set(b.astype(jnp.float32))

    kernel = functools.partial(_mlp_kernel, (h0, h1, h2, out_pad))

    layer_dims = [input_size, h0, h1, h2, out_pad]
    flops = 2 * padded_batch * sum(layer_dims[i] * layer_dims[i + 1] for i in range(4))
    bytes_accessed = (
        padded_batch * input_size * 2          # bf16 x
        + padded_batch * out_pad * 4           # f32 padded output
        + sum(int(w.size) * 2 for w in (w1, w2, w3, w4))
        + int(b_packed.size) * 4
    )
    cost = pl.CostEstimate(
        flops=flops,
        transcendentals=padded_batch * out_pad,   # exp + approx reciprocal
        bytes_accessed=bytes_accessed,
    )

    out_padded = pl.pallas_call(
        kernel,
        out_shape=jax.ShapeDtypeStruct((padded_batch, out_pad), jnp.float32),
        grid=grid,
        in_specs=[
            pl.BlockSpec((tile_b, input_size), lambda i: (i, 0)),  # x: per-step tile
            pl.BlockSpec(w1.shape, lambda i: (0, 0)),              # weights: resident
            pl.BlockSpec(w2.shape, lambda i: (0, 0)),
            pl.BlockSpec(w3.shape, lambda i: (0, 0)),
            pl.BlockSpec(w4.shape, lambda i: (0, 0)),
            pl.BlockSpec(b_packed.shape, lambda i: (0, 0)),        # packed biases
        ],
        out_specs=pl.BlockSpec((tile_b, out_pad), lambda i: (i, 0)),
        compiler_params=pltpu.CompilerParams(
            dimension_semantics=("parallel",),      # shards grid across v7x's 2 TCs
            vmem_limit_bytes=32 * 1024 * 1024,      # safe on v5e/v6e/v7x; usage ~1 MiB
        ),
        cost_estimate=cost,
    )(xp, w1, w2, w3, w4, b_packed)

    return out_padded[:batch, :out_size]


def init_params(key, input_size, hidden_size, output_size):
    """Deterministic PyTorch-style init: U(-1/sqrt(fan_in), 1/sqrt(fan_in))."""
    dims = [input_size, hidden_size[0], hidden_size[1], hidden_size[2], output_size]
    params = []
    for i in range(4):
        key, kw, kb = jax.random.split(key, 3)
        fan_in, fan_out = dims[i], dims[i + 1]
        bound = 1.0 / jnp.sqrt(fan_in)
        w = jax.random.uniform(kw, (fan_in, fan_out), jnp.float32, -bound, bound)
        b = jax.random.uniform(kb, (fan_out,), jnp.float32, -bound, bound)
        params.append((w, b))
    return params


def reference_forward(x, params, compute_dtype=jnp.bfloat16):
    """Pure-JAX reference mirroring the kernel's bf16-operand / f32-accum math."""
    h = x
    for i, (w, b) in enumerate(params):
        h = jnp.dot(h.astype(compute_dtype), w.astype(compute_dtype),
                    preferred_element_type=jnp.float32) + b
        if i < 3:
            h = jnp.maximum(h, 0.0)
    return jax.nn.sigmoid(h)


if __name__ == "__main__":
    key = jax.random.PRNGKey(0)
    batch = 8
    input_size = 32
    hidden_size = (64, 32, 16)
    output_size = 4

    key, kx = jax.random.split(key)
    x = jax.random.normal(kx, (batch, input_size), dtype=jnp.float32)

    params = init_params(key, input_size, hidden_size, output_size)

    out = detector_forward(x, params)
    out = jax.block_until_ready(out)

    ref = reference_forward(x, params)
    assert out.shape == (batch, output_size), out.shape
    assert jnp.allclose(out, ref, atol=1e-2, rtol=1e-2), "mismatch vs reference"

    print("KERNEL_OK")
</pallas_src>

<mosaic_0001>
module attributes {stable_mosaic.version = 11 : i64} {
  func.func @_mlp_kernel(%arg0: i32, %arg1: memref<8x32xbf16, #tpu.memory_space<vmem>>, %arg2: memref<32x64xbf16, #tpu.memory_space<vmem>>, %arg3: memref<64x32xbf16, #tpu.memory_space<vmem>>, %arg4: memref<32x16xbf16, #tpu.memory_space<vmem>>, %arg5: memref<16x128xbf16, #tpu.memory_space<vmem>>, %arg6: memref<4x128xf32, #tpu.memory_space<vmem>>, %arg7: memref<8x128xf32, #tpu.memory_space<vmem>>) attributes {dimension_semantics = [#tpu.dimension_semantics<parallel>], iteration_bounds = array<i64: 1>, scalar_prefetch = 0 : i64, scratch_operands = 0 : i64, tpu.core_type = #tpu.core_type<tc>, window_params = [{transform_indices = @transform_0, window_bounds = array<i64: 8, 32>}, {pipeline_mode = #tpu.pipeline_mode<synchronous>, transform_indices = @transform_1, window_bounds = array<i64: 32, 64>}, {pipeline_mode = #tpu.pipeline_mode<synchronous>, transform_indices = @transform_2, window_bounds = array<i64: 64, 32>}, {pipeline_mode = #tpu.pipeline_mode<synchronous>, transform_indices = @transform_3, window_bounds = array<i64: 32, 16>}, {pipeline_mode = #tpu.pipeline_mode<synchronous>, transform_indices = @transform_4, window_bounds = array<i64: 16, 128>}, {pipeline_mode = #tpu.pipeline_mode<synchronous>, transform_indices = @transform_5, window_bounds = array<i64: 4, 128>}, {transform_indices = @transform_6, window_bounds = array<i64: 8, 128>}]} {
    %c0 = arith.constant 0 : index
    %c0_0 = arith.constant 0 : index
    %0 = vector.load %arg1[%c0, %c0_0] : memref<8x32xbf16, #tpu.memory_space<vmem>>, vector<8x32xbf16>
    %c0_1 = arith.constant 0 : index
    %c0_2 = arith.constant 0 : index
    %1 = vector.load %arg2[%c0_1, %c0_2] : memref<32x64xbf16, #tpu.memory_space<vmem>>, vector<32x64xbf16>
    %cst = arith.constant dense<0.000000e+00> : vector<8x64xf32>
    %2 = tpu.matmul %0, %1, %cst {dimension_numbers = #tpu.dot_dimension_numbers<[1], [0], [0], [1], [0, 0, 1, 1], [], []>} : vector<8x32xbf16>, vector<32x64xbf16>, vector<8x64xf32> -> vector<8x64xf32>
    %c0_3 = arith.constant 0 : index
    %c0_4 = arith.constant 0 : index
    %3 = vector.load %arg6[%c0_3, %c0_4] : memref<4x128xf32, #tpu.memory_space<vmem>>, vector<1x64xf32>
    %4 = vector.broadcast %3 : vector<1x64xf32> to vector<8x64xf32>
    %5 = arith.addf %2, %4 : vector<8x64xf32>
    %cst_5 = arith.constant 0.000000e+00 : f32
    %6 = vector.broadcast %cst_5 : f32 to vector<8x64xf32>
    %7 = arith.maximumf %5, %6 : vector<8x64xf32>
    %8 = arith.truncf %7 : vector<8x64xf32> to vector<8x64xbf16>
    %c0_6 = arith.constant 0 : index
    %c0_7 = arith.constant 0 : index
    %9 = vector.load %arg3[%c0_6, %c0_7] : memref<64x32xbf16, #tpu.memory_space<vmem>>, vector<64x32xbf16>
    %cst_8 = arith.constant dense<0.000000e+00> : vector<8x32xf32>
    %10 = tpu.matmul %8, %9, %cst_8 {dimension_numbers = #tpu.dot_dimension_numbers<[1], [0], [0], [1], [0, 0, 1, 1], [], []>} : vector<8x64xbf16>, vector<64x32xbf16>, vector<8x32xf32> -> vector<8x32xf32>
    %c1 = arith.constant 1 : index
    %c0_9 = arith.constant 0 : index
    %11 = vector.load %arg6[%c1, %c0_9] : memref<4x128xf32, #tpu.memory_space<vmem>>, vector<1x32xf32>
    %12 = vector.broadcast %11 : vector<1x32xf32> to vector<8x32xf32>
    %13 = arith.addf %10, %12 : vector<8x32xf32>
    %cst_10 = arith.constant 0.000000e+00 : f32
    %14 = vector.broadcast %cst_10 : f32 to vector<8x32xf32>
    %15 = arith.maximumf %13, %14 : vector<8x32xf32>
    %16 = arith.truncf %15 : vector<8x32xf32> to vector<8x32xbf16>
    %c0_11 = arith.constant 0 : index
    %c0_12 = arith.constant 0 : index
    %17 = vector.load %arg4[%c0_11, %c0_12] : memref<32x16xbf16, #tpu.memory_space<vmem>>, vector<32x16xbf16>
    %cst_13 = arith.constant dense<0.000000e+00> : vector<8x16xf32>
    %18 = tpu.matmul %16, %17, %cst_13 {dimension_numbers = #tpu.dot_dimension_numbers<[1], [0], [0], [1], [0, 0, 1, 1], [], []>} : vector<8x32xbf16>, vector<32x16xbf16>, vector<8x16xf32> -> vector<8x16xf32>
    %c2 = arith.constant 2 : index
    %c0_14 = arith.constant 0 : index
    %19 = vector.load %arg6[%c2, %c0_14] : memref<4x128xf32, #tpu.memory_space<vmem>>, vector<1x16xf32>
    %20 = vector.broadcast %19 : vector<1x16xf32> to vector<8x16xf32>
    %21 = arith.addf %18, %20 : vector<8x16xf32>
    %cst_15 = arith.constant 0.000000e+00 : f32
    %22 = vector.broadcast %cst_15 : f32 to vector<8x16xf32>
    %23 = arith.maximumf %21, %22 : vector<8x16xf32>
    %24 = arith.truncf %23 : vector<8x16xf32> to vector<8x16xbf16>
    %c0_16 = arith.constant 0 : index
    %c0_17 = arith.constant 0 : index
    %25 = vector.load %arg5[%c0_16, %c0_17] : memref<16x128xbf16, #tpu.memory_space<vmem>>, vector<16x128xbf16>
    %cst_18 = arith.constant dense<0.000000e+00> : vector<8x128xf32>
    %26 = tpu.matmul %24, %25, %cst_18 {dimension_numbers = #tpu.dot_dimension_numbers<[1], [0], [0], [1], [0, 0, 1, 1], [], []>} : vector<8x16xbf16>, vector<16x128xbf16>, vector<8x128xf32> -> vector<8x128xf32>
    %c3 = arith.constant 3 : index
    %c0_19 = arith.constant 0 : index
    %27 = vector.load %arg6[%c3, %c0_19] : memref<4x128xf32, #tpu.memory_space<vmem>>, vector<1x128xf32>
    %28 = vector.broadcast %27 : vector<1x128xf32> to vector<8x128xf32>
    %29 = arith.addf %26, %28 : vector<8x128xf32>
    %cst_20 = arith.constant 0.000000e+00 : f32
    %30 = vector.broadcast %cst_20 : f32 to vector<8x128xf32>
    %31 = arith.subf %30, %29 : vector<8x128xf32>
    %32 = math.exp %31 : vector<8x128xf32>
    %cst_21 = arith.constant 1.000000e+00 : f32
    %33 = vector.broadcast %cst_21 : f32 to vector<8x128xf32>
    %34 = arith.addf %33, %32 : vector<8x128xf32>
    %35 = tpu.reciprocal %34 {approx = true} : vector<8x128xf32> -> vector<8x128xf32>
    %c0_22 = arith.constant 0 : index
    %c0_23 = arith.constant 0 : index
    %36 = vector.load %arg7[%c0_22, %c0_23] : memref<8x128xf32, #tpu.memory_space<vmem>>, vector<8x128xf32>
    tpu.vector_store %arg7[%c0_22, %c0_23], %35 {strides = array<i32>} : memref<8x128xf32, #tpu.memory_space<vmem>>, vector<8x128xf32>,
    return
  }
  func.func @transform_0(%arg0: i32) -> (i32, i32) {
    %c0_i32 = arith.constant 0 : i32
    %c0_i32_0 = arith.constant 0 : i32
    return %arg0, %c0_i32 : i32, i32
  }
  func.func @transform_1(%arg0: i32) -> (i32, i32) {
    %c0_i32 = arith.constant 0 : i32
    %c0_i32_0 = arith.constant 0 : i32
    %c0_i32_1 = arith.constant 0 : i32
    return %c0_i32, %c0_i32_0 : i32, i32
  }
  func.func @transform_2(%arg0: i32) -> (i32, i32) {
    %c0_i32 = arith.constant 0 : i32
    %c0_i32_0 = arith.constant 0 : i32
    %c0_i32_1 = arith.constant 0 : i32
    return %c0_i32, %c0_i32_0 : i32, i32
  }
  func.func @transform_3(%arg0: i32) -> (i32, i32) {
    %c0_i32 = arith.constant 0 : i32
    %c0_i32_0 = arith.constant 0 : i32
    %c0_i32_1 = arith.constant 0 : i32
    return %c0_i32, %c0_i32_0 : i32, i32
  }
  func.func @transform_4(%arg0: i32) -> (i32, i32) {
    %c0_i32 = arith.constant 0 : i32
    %c0_i32_0 = arith.constant 0 : i32
    %c0_i32_1 = arith.constant 0 : i32
    return %c0_i32, %c0_i32_0 : i32, i32
  }
  func.func @transform_5(%arg0: i32) -> (i32, i32) {
    %c0_i32 = arith.constant 0 : i32
    %c0_i32_0 = arith.constant 0 : i32
    %c0_i32_1 = arith.constant 0 : i32
    return %c0_i32, %c0_i32_0 : i32, i32
  }
  func.func @transform_6(%arg0: i32) -> (i32, i32) {
    %c0_i32 = arith.constant 0 : i32
    %c0_i32_0 = arith.constant 0 : i32
    return %arg0, %c0_i32 : i32, i32
  }
}

</mosaic_0001>

<bundles_post_ra>
// kernel: tpu_custom_call.1
= control target key start
LH: loop header
LB: loop body
LE: loop exit
PB: predicated region body
PF: predicated region fallthrough
CT: control target
= control target key end

     0   :  { %v421_v1 = vmov 0.0   ;;  %vm422_vm0 = vmmov 0   ;;  %vm47_vm1 = vcmask 261120   ;;  %s510_s0 = inlined_call_operand.vmem [shape: bf16[8,32], index: 0, kind: input, shape index: {}]   ;;  %s511_s1 = inlined_call_operand.vmem [shape: bf16[32,64], index: 1, kind: input, shape index: {}]   ;;  %s512_s2 = inlined_call_operand.vmem [shape: bf16[64,32], index: 2, kind: input, shape index: {}]   ;;  %s513_s3 = inlined_call_operand.vmem [shape: bf16[32,16], index: 3, kind: input, shape index: {}]   ;;  %s514_s4 = inlined_call_operand.vmem [shape: bf16[16,128], index: 4, kind: input, shape index: {}]   ;;  %s515_s5 = inlined_call_operand.vmem [shape: f32[4,128], index: 5, kind: input, shape index: {}]   ;;  %s516_s6 = inlined_call_operand.hbm [shape: f32[8,128], index: 6, kind: output, shape index: {}]  }
   0x1   :  { %v386_v0 = vld [vmem:[%s511_s1 + $0x8] sm:$0xff]   ;;  %349 = vmatprep.subr.bf16.mxu0 %v421_v1  ;;  %357 = vmatprep.subr.bf16.mxu1 %v421_v1  ;;  %v387_v2 = vld [vmem:[%s511_s1] sm:$0xff]   ;;  %v388_v3 = vld [vmem:[%s512_s2 + $0x18] sm:$0xff]  }
   0x2   :  { %350 = vmatpush3.bf16.msra.mxu0 %v386_v0  ;;  %353 = vmatprep.mubr.msk.bf16.mxu0 %vm422_vm0, %v421_v1  ;;  %v25_v4 = vld [vmem:[%s510_s0] sm:$0xf]  ;;  %v389_v5 = vld [vmem:[%s512_s2 + $0x10] sm:$0xff]  }
   0x3   :  { %351 = vmatprep.subr.bf16.mxu0 %v421_v1  ;;  %365 = vmatprep.mubr.msk.bf16.mxu1 %vm422_vm0, %v421_v1 }
   0x4   :  { %358 = vmatpush3.bf16.msra.mxu1 %v388_v3 }
   0x5   :  { %359 = vmatprep.subr.bf16.mxu1 %v421_v1 }
   0x6   :  { %352 = vmatpush3.bf16.msra.mxu0 %v387_v2 }
   0x7   :  { %369 = vmatprep.subr.bf16.mxu0 %v421_v1 }
   0x8   :  { %360 = vmatpush3.bf16.msra.mxu1 %v389_v5 }
   0x9   :  { %11 = vsyncpa [#allocation3], 0  ;;  %354 = vmatmul.mubr.msk.bf16.vlgmr.msra.gmra.mxu0 %vm47_vm1, %v25_v4  ;;  %361 = vmatprep.subr.bf16.mxu1 %v421_v1  ;;  %v390_v6 = vld [vmem:[%s512_s2 + $0x8] sm:$0xff]   ;;  %v391_v7 = vld [vmem:[%s512_s2] sm:$0xff]   ;;  %vm130_vm2 = vcmask 523264   ;;  %vm255_vm3 = vcmask 130048  }
   0xa   :  { %373 = vmatprep.mubr.msk.bf16.mxu0 %vm422_vm0, %v421_v1  ;;  %v392_v8 = vld [vmem:[%s513_s3 + $0x8] sm:$0xff]   ;;  %v319_v9 = vld [vmem:[%s515_s5] ss:$0 sm:$0xff]  ;;  %v323_v18 = vld [vmem:[%s515_s5 + $0x1] ss:$0 sm:$0xff]  ;;  %s423_s20 = smov [#allocation2]  }
   0xb   :  { %370 = vmatpush3.bf16.msra.mxu0 %v392_v8  ;;  %v393_v17 = vld [vmem:[%s513_s3] sm:$0xff]   ;;  %s311_s21 = sshll.u32 %s423_s20, 4  ;;  %s312_s21 = int_to_ptr.vmem [resolvable:$true] %s311_s21 }
   0xc   :  { %362 = vmatpush3.bf16.msra.mxu1 %v390_v6  ;;  %371 = vmatprep.subr.bf16.mxu0 %v421_v1  ;;  %v394_v24 = vld [vmem:[%s514_s4] sm:$0xff]   ;;  %s399_s22 = scalar_lea.vmem %s312_s21, 128  ;;  %p404_p1 = scmp.lt.s32.totalorder %s312_s21, %s312_s21 }
   0xd   :  { %363 = vmatprep.subr.bf16.mxu1 %v421_v1  ;;  %v329_v27 = vld [vmem:[%s515_s5 + $0x2] ss:$0 sm:$0xff]  ;;  %v333_v35 = vld [vmem:[%s515_s5 + $0x3] ss:$0 sm:$0xff]  ;;  %p400_p0 = scmp.ne.s32.totalorder %s312_s21, %s399_s22  ;;  %p405_p2 = scmp.lt.s32.totalorder %s399_s22, %s399_s22 }
   0xf   :  { %372 = vmatpush3.bf16.msra.mxu0 %v393_v17  ;;  %p406_p3 = por %p405_p2, %p404_p1 }
  0x10   :  { %364 = vmatpush3.bf16.msra.mxu1 %v391_v7  ;;  %377 = vmatprep.subr.bf16.mxu0 %v421_v1 }
  0x11   :  { %p407_p4 = pnand %p406_p3, %p400_p0 }
  0xc9   :  { %v85_v10 = vpop.f32.mrf.mxu0 }
  0xca   :  { %v86_v11 = vadd.f32 %v319_v9, %v85_v10 }
  0xcb   :  { %v355_v12 = vpop.f32.mrf.mxu0 }
  0xcc   :  { %v91_v13 = vmax.f32 %v86_v11, 0.0 }
  0xcd   :  { %v88_v14 = vpop.f32.mrf.mxu0 }
  0xce   :  { %v92_v15 = vpack.c.bf16 %v91_v13, %v91_v13 }
  0xcf   :  { %v356_v16 = vpop.f32.mrf.mxu0 }
  0xd0   :  { %366 = vmatmul.mubr.msk.bf16.vlgmr.msra.gmra.mxu1 %vm130_vm2, %v92_v15 }
 0x190   :  { %v168_v19 = vpop.f32.mrf.mxu1 }
 0x191   :  { %v169_v20 = vadd.f32 %v323_v18, %v168_v19 }
 0x192   :  { %v367_v21 = vpop.f32.mrf.mxu1 }
 0x193   :  { %v174_v22 = vmax.f32 %v169_v20, 0.0 }
 0x194   :  { %v171_v23 = vpop.f32.mrf.mxu1 }
 0x195   :  { %v175_v25 = vpack.c.bf16 %v174_v22, %v174_v22 }
 0x196   :  { %v368_v26 = vpop.f32.mrf.mxu1 }
 0x197   :  { %374 = vmatmul.mubr.msk.bf16.vlgmr.msra.gmra.mxu0 %vm47_vm1, %v175_v25 }
 0x198   :  { %378 = vmatpush3.bf16.msra.mxu0 %v394_v24  ;;  %379 = vmatprep.mubr.msk.bf16.mxu0 %vm422_vm0, %v421_v1 }
 0x257   :  { %v234_v28 = vpop.f32.mrf.mxu0 }
 0x258   :  { %v235_v29 = vadd.f32 %v329_v27, %v234_v28 }
 0x259   :  { %v375_v30 = vpop.f32.mrf.mxu0 }
 0x25a   :  { %v240_v31 = vmax.f32 %v235_v29, 0.0 }
 0x25b   :  { %v237_v32 = vpop.f32.mrf.mxu0 }
 0x25c   :  { %v241_v33 = vpack.c.bf16 %v240_v31, %v240_v31 }
 0x25d   :  { %v376_v34 = vpop.f32.mrf.mxu0 }
 0x25e   :  { %380 = vmatmul.mubr.msk.bf16.vlgmr.msra.gmra.mxu0 %vm255_vm3, %v241_v33 }
 0x31e   :  { %v293_v36 = vpop.f32.mrf.mxu0 }
 0x31f   :  { %v294_v37 = vadd.f32 %v333_v35, %v293_v36 }
 0x320   :  { %v381_v38 = vpop.f32.mrf.mxu0 }
 0x321   :  { %v299_v39 = vsub.f32 0.0, %v294_v37 }
 0x322   :  { %v296_v40 = vpop.f32.mrf.mxu0 }
 0x323   :  { %v300_v41 = vmul.f32 1.442695, %v299_v39 }
 0x324   :  { %v382_v42 = vpop.f32.mrf.mxu0 }
 0x325   :  { %395 = vpow2.f32 %v300_v41 }
 0x332   :  { %v396_v43 = vpop.eup %395 }
 0x333   :  { %v302_v44 = vadd.f32 1.0, %v396_v43 }
 0x335   :  { %397 = vrcp.f32 %v302_v44 }
 0x342   :  { %v398_v45 = vpop.eup %397 }
 0x343   :  { %304 = vst [vmem:[#allocation2] sm:$0xff] %v398_v45 }
 0x344   :  { %410 = shalt.err (!%p407_p4)
}
 0x345   :  { %314 = dma.vmem_to_hbm [thread:$0]  %s312_s21, 128, %s516_s6, [#allocation3]  }
 0x346   :  { %419 = dma.done.wait [#allocation3], 128  }
 0x347   :  { %420 = vsyncadd [#allocation3], 4294967168 }
 0x348   :  { %318 = vsyncpa [#allocation3], 1 }

</bundles_post_ra>
